<compile_context>
chip_gen: v7x
topology: tpu7x:2x2x1
jax: 0.10.0
libtpu: 0.0.40
codegen_flags: <defaults>
</compile_context>

<pallas_src>
import functools

import jax
import jax.numpy as jnp
from jax import lax
from jax.experimental import pallas as pl
from jax.experimental.pallas import tpu as pltpu

LANES = 128
MAX_TILE_ROWS_REDUCE = 4096   # 4096 x 128 f32 = 2 MiB / input / buffer -> 8 MiB
MAX_TILE_ROWS_MAP = 2048      # 3 streams x 2 buffers x 1 MiB = 6 MiB (v5e-safe)
VMEM_LIMIT_BYTES = 32 * 1024 * 1024
NUM_CORE_SPLITS = 2           # leading grid axis (2 TCs on v7x; serial elsewhere)


def _detect_num_tensorcores():
    """Best-effort probe for TensorCores per device (2 on v7x)."""
    try:
        dev = jax.devices()[0]
    except Exception:
        return 1
    for attr in ("num_cores", "core_count"):
        v = getattr(dev, attr, None)
        if isinstance(v, int) and 1 <= v <= 8:
            return v
    return 1


_NUM_CORES = _detect_num_tensorcores()


def _sublane_multiple(dtype):
    # native sublane tiling: 8 for 4-byte, 16 for 2-byte, 32 for 1-byte dtypes
    return max(8, 32 // jnp.dtype(dtype).itemsize)


# ---------------------------------------------------------------------------
# Elementwise focal-loss math (shared by kernels and the JAX tail fold).
# ---------------------------------------------------------------------------
def _focal_elementwise(x, t, alpha, gamma):
    bce = jnp.maximum(x, 0.0) - x * t + jnp.log1p(jnp.exp(-jnp.abs(x)))
    pt = jnp.exp(-bce)
    q = 1.0 - pt
    g = float(gamma)
    if g == 0.0:
        w = None
    elif g == int(g) and g > 0:
        w = q                          # integer gamma: repeated VPU multiply
        for _ in range(int(g) - 1):
            w = w * q
    else:
        w = jnp.power(jnp.maximum(q, 0.0), g)   # clamp avoids log(<0) NaN
    fl = bce if w is None else w * bce
    if float(alpha) != 1.0:
        fl = float(alpha) * fl
    return fl


# ---------------------------------------------------------------------------
# Reduction kernel (mean / sum): per-core partial sums into a resident
# (8, 128) output block (accumulator pattern, no scratch).
# ---------------------------------------------------------------------------
def _focal_loss_sum_kernel(x_ref, t_ref, out_ref, *, alpha, gamma,
                           n_steps, steps_per_core, tile_rows, rem_rows):
    c = pl.program_id(0)
    i = pl.program_id(1)
    step = c * steps_per_core + i

    @pl.when(i == 0)
    def _():
        out_ref[...] = jnp.zeros_like(out_ref)

    x = x_ref[...].astype(jnp.float32)
    t = t_ref[...].astype(jnp.float32)
    fl = _focal_elementwise(x, t, alpha, gamma)

    n_full = n_steps - 1 if rem_rows else n_steps   # static Python int

    # Hot path: full tiles, no masking (scalar compare only).  Phantom steps
    # (clamped index_map for the uneven core split) have step >= n_steps and
    # are skipped entirely.
    @pl.when(step < n_full)
    def _():
        out_ref[...] += jnp.sum(fl.reshape(tile_rows // 8, 8, LANES), axis=0)

    if rem_rows:  # traced only when a partial tail tile actually exists
        @pl.when(step == n_full)
        def _():
            row_ids = lax.broadcasted_iota(jnp.int32, (tile_rows, LANES), 0)
            flm = jnp.where(row_ids < rem_rows, fl, 0.0)
            out_ref[...] += jnp.sum(flm.reshape(tile_rows // 8, 8, LANES), axis=0)


# ---------------------------------------------------------------------------
# Elementwise kernel (reduction='none').
# ---------------------------------------------------------------------------
def _focal_loss_map_kernel(x_ref, t_ref, o_ref, *, alpha, gamma):
    x = x_ref[...].astype(jnp.float32)
    t = t_ref[...].astype(jnp.float32)
    o_ref[...] = _focal_elementwise(x, t, alpha, gamma).astype(o_ref.dtype)


# ---------------------------------------------------------------------------
# pallas_call wrappers.
# ---------------------------------------------------------------------------
def _reduce_partials(x2, t2, *, alpha, gamma, tile_rows, n_steps, rem_rows,
                     num_splits):
    steps_per_core = pl.cdiv(n_steps, num_splits)

    def in_index_map(c, i):
        # Clamp phantom trailing steps onto the last real block; their
        # contribution is skipped in-kernel (step >= n_steps).
        return (jnp.minimum(c * steps_per_core + i, n_steps - 1), 0)

    kernel = functools.partial(
        _focal_loss_sum_kernel, alpha=alpha, gamma=gamma, n_steps=n_steps,
        steps_per_core=steps_per_core, tile_rows=tile_rows, rem_rows=rem_rows)

    in_spec = pl.BlockSpec((tile_rows, LANES), in_index_map)

    n_elems = x2.shape[0] * LANES
    cost = pl.CostEstimate(
        flops=12 * n_elems,
        transcendentals=3 * n_elems,
        bytes_accessed=int(x2.size * x2.dtype.itemsize
                           + t2.size * t2.dtype.itemsize
                           + num_splits * 8 * LANES * 4))

    # Use CORE_PARALLEL only when we positively detect a matching number of
    # TensorCores (v7x); otherwise plain PARALLEL (serial loop on 1-TC chips,
    # megacore-sharded where supported).
    if num_splits > 1 and _NUM_CORES == num_splits:
        lead_sem = pltpu.CORE_PARALLEL
    else:
        lead_sem = pltpu.PARALLEL

    return pl.pallas_call(
        kernel,
        out_shape=jax.ShapeDtypeStruct((num_splits * 8, LANES), jnp.float32),
        grid_spec=pltpu.PrefetchScalarGridSpec(
            num_scalar_prefetch=0,
            grid=(num_splits, steps_per_core),
            in_specs=[in_spec, in_spec],
            out_specs=pl.BlockSpec((8, LANES), lambda c, i: (c, 0)),
        ),
        compiler_params=pltpu.CompilerParams(
            dimension_semantics=(lead_sem, pltpu.ARBITRARY),
            vmem_limit_bytes=VMEM_LIMIT_BYTES),
        cost_estimate=cost,
    )(x2, t2)


def _map_call(x2, t2, *, alpha, gamma, out_dtype):
    rows = x2.shape[0]
    tile_rows = min(MAX_TILE_ROWS_MAP, rows)
    n_steps = pl.cdiv(rows, tile_rows)
    kernel = functools.partial(_focal_loss_map_kernel, alpha=alpha, gamma=gamma)
    tile_spec = pl.BlockSpec((tile_rows, LANES), lambda i: (i, 0))
    return pl.pallas_call(
        kernel,
        out_shape=jax.ShapeDtypeStruct((rows, LANES), out_dtype),
        grid_spec=pltpu.PrefetchScalarGridSpec(
            num_scalar_prefetch=0,
            grid=(n_steps,),
            in_specs=[tile_spec, tile_spec],
            out_specs=tile_spec,
        ),
        compiler_params=pltpu.CompilerParams(
            dimension_semantics=(pltpu.PARALLEL,),
            vmem_limit_bytes=VMEM_LIMIT_BYTES),
    )(x2, t2)


def focal_loss(inputs, targets, *, alpha=1.0, gamma=2.0, reduction="mean"):
    """Pallas TPU focal loss.

    inputs/targets: same shape (any layout, e.g. NCHW).  They are streamed in
    their native dtype and upcast to f32 in-kernel, so targets may be passed
    as bf16 / int8 (exact for binary {0,1}) to cut HBM read traffic.
    """
    assert inputs.shape == targets.shape
    n = int(inputs.size)
    orig_shape = inputs.shape
    alpha = float(alpha)
    gamma = float(gamma)

    sub = max(_sublane_multiple(inputs.dtype), _sublane_multiple(targets.dtype))
    base = sub * LANES
    n_main = (n // base) * base        # kernel-processed aligned prefix

    x_flat = inputs.reshape(-1)
    t_flat = targets.reshape(-1)

    if reduction == "none":
        out_dtype = (inputs.dtype
                     if jnp.issubdtype(inputs.dtype, jnp.floating)
                     else jnp.float32)
        pieces = []
        if n_main > 0:
            xm = (x_flat if n_main == n else x_flat[:n_main])
            tm = (t_flat if n_main == n else t_flat[:n_main])
            out2 = _map_call(xm.reshape(n_main // LANES, LANES),
                             tm.reshape(n_main // LANES, LANES),
                             alpha=alpha, gamma=gamma, out_dtype=out_dtype)
            pieces.append(out2.reshape(-1))
        if n_main < n:
            xt = x_flat[n_main:].astype(jnp.float32)
            tt = t_flat[n_main:].astype(jnp.float32)
            pieces.append(_focal_elementwise(xt, tt, alpha, gamma).astype(out_dtype))
        out = pieces[0] if len(pieces) == 1 else jnp.concatenate(pieces)
        return out.reshape(orig_shape)

    if reduction not in ("mean", "sum"):
        raise ValueError(f"unsupported reduction: {reduction}")

    total = jnp.zeros((), jnp.float32)
    if n_main > 0:
        xm = (x_flat if n_main == n else x_flat[:n_main])
        tm = (t_flat if n_main == n else t_flat[:n_main])
        rows = n_main // LANES
        tile_rows = min(MAX_TILE_ROWS_REDUCE, rows)
        n_steps = pl.cdiv(rows, tile_rows)
        rem_rows = rows % tile_rows
        num_splits = min(NUM_CORE_SPLITS, n_steps)
        partials = _reduce_partials(
            xm.reshape(rows, LANES), tm.reshape(rows, LANES),
            alpha=alpha, gamma=gamma, tile_rows=tile_rows, n_steps=n_steps,
            rem_rows=rem_rows, num_splits=num_splits)
        total = total + jnp.sum(partials)
    if n_main < n:
        # tiny (< sub*128 element) tail folded in with plain JAX: no jnp.pad
        # round trip of the full inputs through HBM.
        xt = x_flat[n_main:].astype(jnp.float32)
        tt = t_flat[n_main:].astype(jnp.float32)
        total = total + jnp.sum(_focal_elementwise(xt, tt, alpha, gamma))

    if reduction == "mean":
        return total / jnp.float32(n)
    return total


# ---------------------------------------------------------------------------
# Pure-JAX reference.
# ---------------------------------------------------------------------------
def focal_loss_ref(inputs, targets, alpha=1.0, gamma=2.0, reduction="mean"):
    x = inputs.astype(jnp.float32)
    t = targets.astype(jnp.float32)
    bce = jnp.maximum(x, 0.0) - x * t + jnp.log1p(jnp.exp(-jnp.abs(x)))
    pt = jnp.exp(-bce)
    fl = alpha * (1.0 - pt) ** gamma * bce
    if reduction == "mean":
        return fl.mean()
    elif reduction == "sum":
        return fl.sum()
    return fl


if __name__ == "__main__":
    key = jax.random.PRNGKey(0)
    kx, kt = jax.random.split(key)

    # NCHW-shaped logits and binary targets (module is elementwise, layout-agnostic).
    B, C, H, W = 2, 4, 16, 16
    logits = jax.random.normal(kx, (B, C, H, W), dtype=jnp.float32)
    targets = jax.random.bernoulli(kt, 0.5, (B, C, H, W)).astype(jnp.float32)

    out_mean = jax.block_until_ready(
        focal_loss(logits, targets, alpha=1.0, gamma=2.0, reduction="mean"))
    ref_mean = focal_loss_ref(logits, targets, reduction="mean")
    assert jnp.allclose(out_mean, ref_mean, rtol=1e-5, atol=1e-5), (out_mean, ref_mean)

    out_sum = jax.block_until_ready(
        focal_loss(logits, targets, alpha=1.0, gamma=2.0, reduction="sum"))
    ref_sum = focal_loss_ref(logits, targets, reduction="sum")
    assert jnp.allclose(out_sum, ref_sum, rtol=1e-5, atol=1e-4), (out_sum, ref_sum)

    out_none = jax.block_until_ready(
        focal_loss(logits, targets, alpha=1.0, gamma=2.0, reduction="none"))
    ref_none = focal_loss_ref(logits, targets, reduction="none")
    assert jnp.allclose(out_none, ref_none, rtol=1e-5, atol=1e-5)

    # Misaligned shape exercises the no-pad aligned-prefix + JAX-tail path.
    k2x, k2t = jax.random.split(kt)
    logits2 = jax.random.normal(k2x, (3, 5, 7, 11), dtype=jnp.float32)
    targets2 = jax.random.bernoulli(k2t, 0.5, (3, 5, 7, 11)).astype(jnp.float32)
    out2 = jax.block_until_ready(
        focal_loss(logits2, targets2, alpha=1.0, gamma=2.0, reduction="mean"))
    ref2 = focal_loss_ref(logits2, targets2, reduction="mean")
    assert jnp.allclose(out2, ref2, rtol=1e-5, atol=1e-5), (out2, ref2)

    print("KERNEL_OK")
</pallas_src>

<mosaic_0001>
module attributes {stable_mosaic.version = 11 : i64} {
  func.func @_focal_loss_sum_kernel(%arg0: i32, %arg1: i32, %arg2: memref<16x128xf32, #tpu.memory_space<vmem>>, %arg3: memref<16x128xf32, #tpu.memory_space<vmem>>, %arg4: memref<8x128xf32, #tpu.memory_space<vmem>>) attributes {dimension_semantics = [#tpu.dimension_semantics<parallel>, #tpu.dimension_semantics<arbitrary>], iteration_bounds = array<i64: 1, 1>, scalar_prefetch = 0 : i64, scratch_operands = 0 : i64, tpu.core_type = #tpu.core_type<tc>, window_params = [{transform_indices = @transform_0, window_bounds = array<i64: 16, 128>}, {transform_indices = @transform_1, window_bounds = array<i64: 16, 128>}, {transform_indices = @transform_2, window_bounds = array<i64: 8, 128>}]} {
    %c1_i32 = arith.constant 1 : i32
    %0 = arith.muli %arg0, %c1_i32 : i32
    %1 = arith.addi %0, %arg1 : i32
    %c0_i32 = arith.constant 0 : i32
    %2 = arith.cmpi eq, %arg1, %c0_i32 : i32
    %3 = arith.extui %2 : i1 to i32
    %c0_i32_0 = arith.constant 0 : i32
    %4 = arith.cmpi ne, %3, %c0_i32_0 : i32
    scf.if %4 {
      %cst_9 = arith.constant 0.000000e+00 : f32
      %27 = vector.broadcast %cst_9 : f32 to vector<8x128xf32>
      %c0_10 = arith.constant 0 : index
      %c0_11 = arith.constant 0 : index
      %28 = vector.load %arg4[%c0_10, %c0_11] : memref<8x128xf32, #tpu.memory_space<vmem>>, vector<8x128xf32>
      tpu.vector_store %arg4[%c0_10, %c0_11], %27 {strides = array<i32>} : memref<8x128xf32, #tpu.memory_space<vmem>>, vector<8x128xf32>,
    } else {
    }
    %c0 = arith.constant 0 : index
    %c0_1 = arith.constant 0 : index
    %5 = vector.load %arg2[%c0, %c0_1] : memref<16x128xf32, #tpu.memory_space<vmem>>, vector<16x128xf32>
    %c0_2 = arith.constant 0 : index
    %c0_3 = arith.constant 0 : index
    %6 = vector.load %arg3[%c0_2, %c0_3] : memref<16x128xf32, #tpu.memory_space<vmem>>, vector<16x128xf32>
    %cst = arith.constant 0.000000e+00 : f32
    %7 = vector.broadcast %cst : f32 to vector<16x128xf32>
    %8 = arith.maximumf %5, %7 : vector<16x128xf32>
    %9 = arith.mulf %5, %6 : vector<16x128xf32>
    %10 = arith.subf %8, %9 : vector<16x128xf32>
    %11 = math.absf %5 : vector<16x128xf32>
    %cst_4 = arith.constant 0.000000e+00 : f32
    %12 = vector.broadcast %cst_4 : f32 to vector<16x128xf32>
    %13 = arith.subf %12, %11 : vector<16x128xf32>
    %14 = math.exp %13 : vector<16x128xf32>
    %15 = math.log1p %14 : vector<16x128xf32>
    %16 = arith.addf %10, %15 : vector<16x128xf32>
    %cst_5 = arith.constant 0.000000e+00 : f32
    %17 = vector.broadcast %cst_5 : f32 to vector<16x128xf32>
    %18 = arith.subf %17, %16 : vector<16x128xf32>
    %19 = math.exp %18 : vector<16x128xf32>
    %cst_6 = arith.constant 1.000000e+00 : f32
    %20 = vector.broadcast %cst_6 : f32 to vector<16x128xf32>
    %21 = arith.subf %20, %19 : vector<16x128xf32>
    %22 = arith.mulf %21, %21 : vector<16x128xf32>
    %23 = arith.mulf %22, %16 : vector<16x128xf32>
    %c1_i32_7 = arith.constant 1 : i32
    %24 = arith.cmpi slt, %1, %c1_i32_7 : i32
    %25 = arith.extui %24 : i1 to i32
    %c0_i32_8 = arith.constant 0 : i32
    %26 = arith.cmpi ne, %25, %c0_i32_8 : i32
    scf.if %26 {
      %c0_9 = arith.constant 0 : index
      %c0_10 = arith.constant 0 : index
      %27 = vector.load %arg4[%c0_9, %c0_10] : memref<8x128xf32, #tpu.memory_space<vmem>>, vector<8x128xf32>
      %28 = vector.shape_cast %23 : vector<16x128xf32> to vector<2x8x128xf32>
      %cst_11 = arith.constant dense<0.000000e+00> : vector<8x128xf32>
      %29 = vector.multi_reduction <add>, %28, %cst_11 [0] : vector<2x8x128xf32> to vector<8x128xf32>
      %30 = arith.addf %27, %29 : vector<8x128xf32>
      %c0_12 = arith.constant 0 : index
      %c0_13 = arith.constant 0 : index
      %31 = vector.load %arg4[%c0_12, %c0_13] : memref<8x128xf32, #tpu.memory_space<vmem>>, vector<8x128xf32>
      tpu.vector_store %arg4[%c0_12, %c0_13], %30 {strides = array<i32>} : memref<8x128xf32, #tpu.memory_space<vmem>>, vector<8x128xf32>,
    } else {
    }
    return
  }
  func.func @transform_0(%arg0: i32, %arg1: i32) -> (i32, i32) {
    %c1_i32 = arith.constant 1 : i32
    %0 = arith.muli %arg0, %c1_i32 : i32
    %1 = arith.addi %0, %arg1 : i32
    %c0_i32 = arith.constant 0 : i32
    %2 = arith.minsi %1, %c0_i32 : i32
    %c0_i32_0 = arith.constant 0 : i32
    %c0_i32_1 = arith.constant 0 : i32
    return %2, %c0_i32_0 : i32, i32
  }
  func.func @transform_1(%arg0: i32, %arg1: i32) -> (i32, i32) {
    %c1_i32 = arith.constant 1 : i32
    %0 = arith.muli %arg0, %c1_i32 : i32
    %1 = arith.addi %0, %arg1 : i32
    %c0_i32 = arith.constant 0 : i32
    %2 = arith.minsi %1, %c0_i32 : i32
    %c0_i32_0 = arith.constant 0 : i32
    %c0_i32_1 = arith.constant 0 : i32
    return %2, %c0_i32_0 : i32, i32
  }
  func.func @transform_2(%arg0: i32, %arg1: i32) -> (i32, i32) {
    %c0_i32 = arith.constant 0 : i32
    %c0_i32_0 = arith.constant 0 : i32
    return %arg0, %c0_i32 : i32, i32
  }
}

</mosaic_0001>

<bundles_post_ra>
// kernel: tpu_custom_call.1
= control target key start
LH: loop header
LB: loop body
LE: loop exit
PB: predicated region body
PF: predicated region fallthrough
CT: control target
= control target key end

     0   :  { %7 = vsyncpa [#allocation3], 0  ;;  %s290_s0 = inlined_call_operand.hbm [shape: f32[16,128], index: 0, kind: input, shape index: {}]   ;;  %s291_s1 = inlined_call_operand.hbm [shape: f32[16,128], index: 1, kind: input, shape index: {}]   ;;  %s292_s2 = inlined_call_operand.hbm [shape: f32[8,128], index: 2, kind: output, shape index: {}]  }
   0x1   :  { %8 = vsyncpa [#allocation6], 0 }
   0x2   :  { %9 = vsyncpa [#allocation4], 0  ;;  %s234_s9 = smov [#allocation2]   ;;  %s162_s13 = scalar_lea.hbm %s290_s0, 256 }
   0x3   :  { %s21_s10 = sshll.u32 %s234_s9, 4  ;;  %p163_p0 = scmp.ne.s32.totalorder %s290_s0, %s162_s13  ;;  %s22_s10 = int_to_ptr.vmem [resolvable:$true] %s21_s10 }
   0x4   :  { %p166_p1 = scmp.lt.u32.totalorder %s162_s13, %s290_s0 }
   0x6   :  { %p168_p2 = pnand %p166_p1, %p163_p0 }
   0x8   :  { %171 = shalt.err (!%p168_p2)
}
   0x9   :  { %s172_s18 = scalar_lea.vmem %s22_s10, 256  ;;  %p177_p4 = scmp.lt.s32.totalorder %s22_s10, %s22_s10 }
   0xa   :  { %p173_p3 = scmp.ne.s32.totalorder %s22_s10, %s172_s18  ;;  %p178_p5 = scmp.lt.s32.totalorder %s172_s18, %s172_s18 }
   0xc   :  { %p179_p6 = por %p178_p5, %p177_p4 }
   0xe   :  { %p180_p7 = pnand %p179_p6, %p173_p3 }
  0x10   :  { %183 = shalt.err (!%p180_p7)
}
  0x11   :  { %s235_s19 = smov 128   ;;  %s236_s20 = smov 8  }
  0x12   :  { %27 = dma.hbm_to_vmem [thread:$0]  %s290_s0, 256, %s22_s10, [#allocation3], %s235_s19, %s235_s19, %s236_s20  }
  0x13   :  { %s237_s23 = smov [#allocation5]   ;;  %s184_s27 = scalar_lea.hbm %s291_s1, 256 }
  0x14   :  { %s39_s24 = sshll.u32 %s237_s23, 4  ;;  %p185_p8 = scmp.ne.s32.totalorder %s291_s1, %s184_s27  ;;  %s40_s24 = int_to_ptr.vmem [resolvable:$true] %s39_s24 }
  0x15   :  { %p188_p9 = scmp.lt.u32.totalorder %s184_s27, %s291_s1 }
  0x17   :  { %p190_p10 = pnand %p188_p9, %p185_p8 }
  0x19   :  { %193 = shalt.err (!%p190_p10)
}
  0x1a   :  { %s194_s4 = scalar_lea.vmem %s40_s24, 256  ;;  %p199_p12 = scmp.lt.s32.totalorder %s40_s24, %s40_s24 }
  0x1b   :  { %p195_p11 = scmp.ne.s32.totalorder %s40_s24, %s194_s4  ;;  %p200_p13 = scmp.lt.s32.totalorder %s194_s4, %s194_s4 }
  0x1d   :  { %p201_p0 = por %p200_p13, %p199_p12 }
  0x1f   :  { %p202_p1 = pnand %p201_p0, %p195_p11 }
  0x21   :  { %205 = shalt.err (!%p202_p1)
}
  0x22   :  { %45 = dma.hbm_to_vmem [thread:$0]  %s291_s1, 256, %s40_s24, [#allocation6], %s235_s19, %s235_s19, %s236_s20  }
  0x23   :  { %228 = dma.done.wait [#allocation3], 256  }
  0x24   :  { %229 = vsyncadd [#allocation3], 4294967040 }
  0x25   :  { %230 = dma.done.wait [#allocation6], 256  }
  0x26   :  { %231 = vsyncadd [#allocation6], 4294967040  ;;  %v66_v0 = vld [vmem:[#allocation2] sm:$0xff]  ;;  %v67_v1 = vld [vmem:[#allocation2 + $0x8] sm:$0xff]  ;;  %s238_s1 = smov [#allocation7]  }
  0x27   :  { %v76_v2 = vand.u32 2147483647, %v66_v0  ;;  %v77_v3 = vand.u32 2147483647, %v67_v1  ;;  %v68_v14 = vld [vmem:[#allocation5] sm:$0xff]  ;;  %v69_v15 = vld [vmem:[#allocation5 + $0x8] sm:$0xff] }
  0x28   :  { %v70_v17 = vmax.f32 %v66_v0, 0.0  ;;  %v72_v18 = vmul.f32 %v68_v14, %v66_v0  ;;  %v71_v21 = vmax.f32 %v67_v1, 0.0  ;;  %v73_v22 = vmul.f32 %v69_v15, %v67_v1  ;;  %s130_s6 = sshll.u32 %s238_s1, 4  ;;  %s131_s6 = int_to_ptr.vmem [resolvable:$true] %s130_s6 }
  0x29   :  { %v78_v4 = vsub.f32 0.0, %v76_v2  ;;  %v79_v5 = vsub.f32 0.0, %v77_v3  ;;  %s206_s7 = scalar_lea.vmem %s131_s6, 128  ;;  %p211_p3 = scmp.lt.s32.totalorder %s131_s6, %s131_s6 }
  0x2a   :  { %v74_v26 = vsub.f32 %v70_v17, %v72_v18  ;;  %v75_v29 = vsub.f32 %v71_v21, %v73_v22  ;;  %p207_p2 = scmp.ne.s32.totalorder %s131_s6, %s206_s7  ;;  %p212_p4 = scmp.lt.s32.totalorder %s206_s7, %s206_s7 }
  0x2b   :  { %v80_v6 = vmul.f32 1.442695, %v78_v4  ;;  %v82_v7 = vmul.f32 1.442695, %v79_v5 }
  0x2c   :  { %p213_p5 = por %p212_p4, %p211_p3 }
  0x2d   :  { %150 = vpow2.f32 %v80_v6 }
  0x2e   :  { %152 = vpow2.f32 %v82_v7  ;;  %p214_p6 = pnand %p213_p5, %p207_p2 }
  0x37   :  { %v151_v8 = vpop.eup %150 }
  0x38   :  { %v153_v9 = vpop.eup %152  ;;  %v84_v10 = vadd.f32 1.0, %v151_v8  ;;  %v87_v12 = vmul.f32 -0.5, %v151_v8  ;;  %v90_v19 = vand.u32 2147483647, %v151_v8 }
  0x39   :  { %v93_v11 = vadd.f32 1.0, %v153_v9  ;;  %v96_v13 = vmul.f32 -0.5, %v153_v9  ;;  %v99_v23 = vand.u32 2147483647, %v153_v9 }
  0x3a   :  { %154 = vlog2.f32 %v84_v10  ;;  %v88_v16 = vadd.f32 1.0, %v87_v12  ;;  %vm91_vm0 = vcmp.lt.f32.partialorder %v90_v19, 0.0004427343 }
  0x3b   :  { %156 = vlog2.f32 %v93_v11  ;;  %v97_v20 = vadd.f32 1.0, %v96_v13  ;;  %vm100_vm1 = vcmp.lt.f32.partialorder %v99_v23, 0.0004427343 }
  0x3c   :  { %v89_v24 = vmul.f32 %v151_v8, %v88_v16 }
  0x3d   :  { %v98_v27 = vmul.f32 %v153_v9, %v97_v20 }
  0x44   :  { %v155_v25 = vpop.eup %154 }
  0x45   :  { %v157_v28 = vpop.eup %156  ;;  %v86_v30 = vmul.f32 0.6931472, %v155_v25 }
  0x46   :  { %v95_v31 = vmul.f32 0.6931472, %v157_v28 }
  0x47   :  { %v92_v32 = vsel %vm91_vm0, %v89_v24, %v86_v30 }
  0x48   :  { %v101_v33 = vsel %vm100_vm1, %v98_v27, %v95_v31  ;;  %v102_v34 = vadd.f32 %v92_v32, %v74_v26 }
  0x49   :  { %v103_v35 = vadd.f32 %v101_v33, %v75_v29 }
  0x4a   :  { %v104_v36 = vsub.f32 0.0, %v102_v34 }
  0x4b   :  { %v105_v37 = vsub.f32 0.0, %v103_v35 }
  0x4c   :  { %v106_v38 = vmul.f32 1.442695, %v104_v36 }
  0x4d   :  { %v108_v39 = vmul.f32 1.442695, %v105_v37 }
  0x4e   :  { %158 = vpow2.f32 %v106_v38 }
  0x4f   :  { %160 = vpow2.f32 %v108_v39 }
  0x58   :  { %v159_v40 = vpop.eup %158 }
  0x59   :  { %v161_v41 = vpop.eup %160  ;;  %v110_v42 = vsub.f32 1.0, %v159_v40 }
  0x5a   :  { %v111_v43 = vsub.f32 1.0, %v161_v41 }
  0x5b   :  { %v112_v44 = vmul.f32 %v110_v42, %v110_v42 }
  0x5c   :  { %v113_v45 = vmul.f32 %v111_v43, %v111_v43 }
  0x5d   :  { %v114_v46 = vmul.f32 %v112_v44, %v102_v34 }
  0x5e   :  { %v115_v47 = vmul.f32 %v113_v45, %v103_v35 }
  0x60   :  { %v121_v48 = vadd.f32 %v115_v47, %v114_v46 }
  0x62   :  { %123 = vst [vmem:[#allocation7] sm:$0xff] %v121_v48 }
  0x63   :  { %217 = shalt.err (!%p214_p6)
}
  0x64   :  { %s218_s10 = scalar_lea.hbm %s292_s2, 128 }
  0x65   :  { %p219_p7 = scmp.ne.s32.totalorder %s292_s2, %s218_s10  ;;  %p222_p8 = scmp.lt.u32.totalorder %s218_s10, %s292_s2 }
  0x67   :  { %p224_p9 = pnand %p222_p8, %p219_p7 }
  0x69   :  { %227 = shalt.err (!%p224_p9)
}
  0x6a   :  { %133 = dma.vmem_to_hbm [thread:$0]  %s131_s6, 128, %s292_s2, [#allocation4]  }
  0x6b   :  { %232 = dma.done.wait [#allocation4], 128  }
  0x6c   :  { %233 = vsyncadd [#allocation4], 4294967168 }
  0x6d   :  { %137 = vsyncpa [#allocation3], 1 }
  0x6e   :  { %138 = vsyncpa [#allocation6], 1 }
  0x6f   :  { %139 = vsyncpa [#allocation4], 1 }

</bundles_post_ra>
